<compile_context>
chip_gen: v7x
topology: tpu7x:2x2x1
jax: 0.10.0
libtpu: 0.0.40
codegen_flags: <defaults>
</compile_context>

<pallas_src>
import functools

import jax
import jax.numpy as jnp
import numpy as np
from jax import lax
from jax.experimental import pallas as pl
from jax.experimental.pallas import tpu as pltpu

BN_EPS = 1e-5


def gam_kernel(x_ref, wt_ref, bt_ref, wg_ref, bg_ref, ww_ref, bw_ref,
               gamma_ref, beta_ref, smask_ref, ssum_ref, o_ref, *, inv_n, eps):
    """All refs live in VMEM.

    x_ref     : (B*C,  HW)   input slab (row b*C + c == x[b, c, :])
    wt_ref    : (B*Ci, B*C)  block-diag theta weight
    bt_ref    : (B*Ci, 1)    theta bias (tiled over B)
    wg_ref    : (B,    B*Ci) block-diag g weight
    bg_ref    : (B,    1)    g bias (tiled over B)
    ww_ref    : (B*C,  B*Ci) block-diag W[0] weight
    bw_ref    : (B*C,  1)    W[0] bias (tiled over B)
    gamma_ref : (B*C,  1)    BN weight (tiled over B)
    beta_ref  : (B*C,  1)    BN bias   (tiled over B)
    smask_ref : (B,    B*Ci) sample mask: smask[b, b'*Ci+i] = (b == b')
    ssum_ref  : (B*C,  B*C)  channel-sum matrix: ssum[bC+c, b'C+c'] = (c == c')
    o_ref     : (B*C,  HW)   output slab
    """
    x = x_ref[...]                                                   # (B*C, HW)

    # ---- batched 1x1 convolutions: one matmul each across the whole batch ---
    theta = jnp.dot(wt_ref[...], x,
                    preferred_element_type=jnp.float32) + bt_ref[...]   # (B*Ci, HW)
    logits = jnp.dot(wg_ref[...], theta,
                     preferred_element_type=jnp.float32) + bg_ref[...]  # (B, HW)

    # ---- per-sample softmax over HW without materializing attn -------------
    m = jnp.max(logits, axis=-1, keepdims=True)                         # (B, 1)
    e = jnp.exp(logits - m)                                              # (B, HW)
    se = jnp.sum(e, axis=-1, keepdims=True)                              # (B, 1)

    # fvec[b, i] = sum_p theta[b, i, p] * e[b, p] / se[b], laid out as a row
    # vector (1, B*Ci).  The e/theta contraction is one K=HW matmul; the
    # sample mask picks the diagonal blocks.
    m2 = lax.dot_general(e, theta, (((1,), (1,)), ((), ())),
                         preferred_element_type=jnp.float32)             # (B, B*Ci)
    smask = smask_ref[...]                                               # (B, B*Ci)
    fnum = jnp.sum(m2 * smask, axis=0, keepdims=True)                    # (1, B*Ci)
    fden = jnp.sum(smask * se, axis=0, keepdims=True)                    # (1, B*Ci)
    # The divide is only (1, B*Ci) wide (softmax denominator already reduced),
    # so an exact divide is free; no HW-wide divide and no attn temporary.
    scale = fnum / fden                                                  # (1, B*Ci)

    # ---- W[0] 1x1 conv with fvec folded into the weight ---------------------
    y = jnp.dot(ww_ref[...] * scale, theta,
                preferred_element_type=jnp.float32) + bw_ref[...]        # (B*C, HW)

    # ---- BatchNorm2d (training mode), single-pass statistics ----------------
    ysum = jnp.sum(y, axis=-1, keepdims=True)                            # (B*C, 1)
    ysq = jnp.sum(y * y, axis=-1, keepdims=True)                         # (B*C, 1)
    # Sum the per-row partials across the batch and re-broadcast per channel
    # in one tiny matmul (no per-sample Python loop, no repeated broadcasts).
    mean = jnp.dot(ssum_ref[...], ysum,
                   preferred_element_type=jnp.float32) * inv_n           # (B*C, 1)
    exsq = jnp.dot(ssum_ref[...], ysq,
                   preferred_element_type=jnp.float32) * inv_n           # (B*C, 1)
    var = exsq - mean * mean                                             # biased var
    inv_std = lax.rsqrt(var + eps)                                       # (B*C, 1)

    # ---- normalize, affine, residual add: one dense (B*C, HW) store ---------
    o_ref[...] = gamma_ref[...] * (y - mean) * inv_std + beta_ref[...] + x


def gam_forward(x, params):
    """x: (B, C, H, W) float32 NCHW -> (B, C, H, W) float32."""
    B, C, H, W = x.shape
    HW = H * W
    Ci = params["wt"].shape[0]
    f32 = jnp.float32

    # Sublane/lane-dense slab: (B*C, HW) = (8, 256) at the demo sizes.
    x_slab = x.reshape(B * C, HW)

    # Tiny parameter plumbing (layout only, done once outside the kernel):
    # block-diagonal weights batch the 1x1 convs across B in a single matmul.
    eye_b = jnp.eye(B, dtype=f32)
    wt_bd = jnp.kron(eye_b, params["wt"])                      # (B*Ci, B*C)
    wg_bd = jnp.kron(eye_b, params["wg"])                      # (B,    B*Ci)
    ww_bd = jnp.kron(eye_b, params["ww"])                      # (B*C,  B*Ci)
    bt_bd = jnp.tile(params["bt"], (B, 1))                     # (B*Ci, 1)
    bg_bd = jnp.tile(params["bg"], (B, 1))                     # (B,    1)
    bw_bd = jnp.tile(params["bw"], (B, 1))                     # (B*C,  1)
    gamma_bc = jnp.tile(params["gamma"], (B, 1))               # (B*C,  1)
    beta_bc = jnp.tile(params["beta"], (B, 1))                 # (B*C,  1)
    smask = jnp.kron(eye_b, jnp.ones((1, Ci), f32))            # (B,    B*Ci)
    ssum = jnp.kron(jnp.ones((B, B), f32), jnp.eye(C, dtype=f32))  # (B*C, B*C)

    kernel = functools.partial(gam_kernel, inv_n=1.0 / float(B * HW), eps=BN_EPS)
    vmem = pl.BlockSpec(memory_space=pltpu.MemorySpace.VMEM)
    out_slab = pl.pallas_call(
        kernel,
        out_shape=jax.ShapeDtypeStruct((B * C, HW), f32),
        in_specs=[vmem] * 11,
        out_specs=vmem,
    )(x_slab, wt_bd, bt_bd, wg_bd, bg_bd, ww_bd, bw_bd,
      gamma_bc, beta_bc, smask, ssum)
    return out_slab.reshape(B, C, H, W)


def gam_reference(x, p):
    """Pure-JAX reference mirroring the PyTorch forward (training-mode BN)."""
    B, C, H, W = x.shape
    HW = H * W
    xf = x.reshape(B, C, HW)
    theta = jnp.einsum("ic,bcp->bip", p["wt"], xf) + p["bt"][None]       # (B,Ci,HW)
    logits = jnp.einsum("oi,bip->bop", p["wg"], theta) + p["bg"][None]   # (B,1,HW)
    attn = jax.nn.softmax(logits, axis=-1)                               # (B,1,HW)
    fvec = jnp.einsum("bip,bop->bio", theta, attn)                       # (B,Ci,1)
    f = theta * fvec                                                     # (B,Ci,HW)
    y = jnp.einsum("ci,bip->bcp", p["ww"], f) + p["bw"][None]            # (B,C,HW)
    mean = jnp.mean(y, axis=(0, 2), keepdims=True)
    var = jnp.mean((y - mean) ** 2, axis=(0, 2), keepdims=True)
    yb = p["gamma"][None] * (y - mean) / jnp.sqrt(var + BN_EPS) + p["beta"][None]
    return (yb + xf).reshape(B, C, H, W)


def make_params(key, in_channels):
    c = in_channels
    ci = max(in_channels // 2, 1)
    ks = jax.random.split(key, 9)
    return {
        # theta: Conv2d(C, Ci, 1)  -> weight (Ci, C), bias (Ci, 1)
        "wt": jax.random.normal(ks[0], (ci, c), jnp.float32) * 0.2,
        "bt": jax.random.normal(ks[1], (ci, 1), jnp.float32) * 0.1,
        # g: Conv2d(Ci, 1, 1)      -> weight (1, Ci), bias (1, 1)
        "wg": jax.random.normal(ks[2], (1, ci), jnp.float32) * 0.2,
        "bg": jax.random.normal(ks[3], (1, 1), jnp.float32) * 0.1,
        # W[0]: Conv2d(Ci, C, 1)   -> weight (C, Ci), bias (C, 1)
        "ww": jax.random.normal(ks[4], (c, ci), jnp.float32) * 0.2,
        "bw": jax.random.normal(ks[5], (c, 1), jnp.float32) * 0.1,
        # W[1]: BatchNorm2d(C) affine params (original module sets these to 0)
        "gamma": jax.random.normal(ks[6], (c, 1), jnp.float32) * 0.5 + 1.0,
        "beta": jax.random.normal(ks[7], (c, 1), jnp.float32) * 0.1,
    }


if __name__ == "__main__":
    B, C, H, W = 2, 4, 16, 16
    key = jax.random.PRNGKey(0)
    k_par, k_x = jax.random.split(key)
    params = make_params(k_par, C)
    x = jax.random.normal(k_x, (B, C, H, W), jnp.float32)

    out = gam_forward(x, params)
    out = jax.block_until_ready(out)

    ref = gam_reference(x, params)
    np.testing.assert_allclose(np.asarray(out), np.asarray(ref), rtol=2e-4, atol=2e-4)

    print("KERNEL_OK")
</pallas_src>

<mosaic_0001>
module attributes {stable_mosaic.version = 11 : i64} {
  func.func @gam_kernel(%arg0: memref<8x256xf32, #tpu.memory_space<vmem>>, %arg1: memref<4x8xf32, #tpu.memory_space<vmem>>, %arg2: memref<4x1xf32, #tpu.memory_space<vmem>>, %arg3: memref<2x4xf32, #tpu.memory_space<vmem>>, %arg4: memref<2x1xf32, #tpu.memory_space<vmem>>, %arg5: memref<8x4xf32, #tpu.memory_space<vmem>>, %arg6: memref<8x1xf32, #tpu.memory_space<vmem>>, %arg7: memref<8x1xf32, #tpu.memory_space<vmem>>, %arg8: memref<8x1xf32, #tpu.memory_space<vmem>>, %arg9: memref<2x4xf32, #tpu.memory_space<vmem>>, %arg10: memref<8x8xf32, #tpu.memory_space<vmem>>, %arg11: memref<8x256xf32, #tpu.memory_space<vmem>>) attributes {dimension_semantics = [], scalar_prefetch = 0 : i64, scratch_operands = 0 : i64, tpu.core_type = #tpu.core_type<tc>} {
    %c0 = arith.constant 0 : index
    %c0_0 = arith.constant 0 : index
    %0 = vector.load %arg0[%c0, %c0_0] : memref<8x256xf32, #tpu.memory_space<vmem>>, vector<8x256xf32>
    %c0_1 = arith.constant 0 : index
    %c0_2 = arith.constant 0 : index
    %1 = vector.load %arg1[%c0_1, %c0_2] : memref<4x8xf32, #tpu.memory_space<vmem>>, vector<4x8xf32>
    %cst = arith.constant dense<0.000000e+00> : vector<4x256xf32>
    %2 = tpu.matmul %1, %0, %cst {dimension_numbers = #tpu.dot_dimension_numbers<[1], [0], [0], [1], [0, 0, 1, 1], [], []>} : vector<4x8xf32>, vector<8x256xf32>, vector<4x256xf32> -> vector<4x256xf32>
    %c0_3 = arith.constant 0 : index
    %c0_4 = arith.constant 0 : index
    %3 = vector.load %arg2[%c0_3, %c0_4] : memref<4x1xf32, #tpu.memory_space<vmem>>, vector<4x1xf32>
    %4 = vector.broadcast %3 : vector<4x1xf32> to vector<4x256xf32>
    %5 = arith.addf %2, %4 : vector<4x256xf32>
    %c0_5 = arith.constant 0 : index
    %c0_6 = arith.constant 0 : index
    %6 = vector.load %arg3[%c0_5, %c0_6] : memref<2x4xf32, #tpu.memory_space<vmem>>, vector<2x4xf32>
    %cst_7 = arith.constant dense<0.000000e+00> : vector<2x256xf32>
    %7 = tpu.matmul %6, %5, %cst_7 {dimension_numbers = #tpu.dot_dimension_numbers<[1], [0], [0], [1], [0, 0, 1, 1], [], []>} : vector<2x4xf32>, vector<4x256xf32>, vector<2x256xf32> -> vector<2x256xf32>
    %c0_8 = arith.constant 0 : index
    %c0_9 = arith.constant 0 : index
    %8 = vector.load %arg4[%c0_8, %c0_9] : memref<2x1xf32, #tpu.memory_space<vmem>>, vector<2x1xf32>
    %9 = vector.broadcast %8 : vector<2x1xf32> to vector<2x256xf32>
    %10 = arith.addf %7, %9 : vector<2x256xf32>
    %cst_10 = arith.constant dense<0xFF800000> : vector<2xf32>
    %11 = vector.multi_reduction <maximumf>, %10, %cst_10 [1] : vector<2x256xf32> to vector<2xf32>
    %12 = vector.shape_cast %11 : vector<2xf32> to vector<2x1xf32>
    %13 = vector.broadcast %12 : vector<2x1xf32> to vector<2x256xf32>
    %14 = arith.subf %10, %13 : vector<2x256xf32>
    %15 = math.exp %14 : vector<2x256xf32>
    %cst_11 = arith.constant dense<0.000000e+00> : vector<2xf32>
    %16 = vector.multi_reduction <add>, %15, %cst_11 [1] : vector<2x256xf32> to vector<2xf32>
    %17 = vector.shape_cast %16 : vector<2xf32> to vector<2x1xf32>
    %cst_12 = arith.constant dense<0.000000e+00> : vector<2x4xf32>
    %18 = tpu.matmul %15, %5, %cst_12 {dimension_numbers = #tpu.dot_dimension_numbers<[1], [1], [0], [0], [0, 0, 1, 0], [], []>} : vector<2x256xf32>, vector<4x256xf32>, vector<2x4xf32> -> vector<2x4xf32>
    %c0_13 = arith.constant 0 : index
    %c0_14 = arith.constant 0 : index
    %19 = vector.load %arg9[%c0_13, %c0_14] : memref<2x4xf32, #tpu.memory_space<vmem>>, vector<2x4xf32>
    %20 = arith.mulf %18, %19 : vector<2x4xf32>
    %cst_15 = arith.constant dense<0.000000e+00> : vector<4xf32>
    %21 = vector.multi_reduction <add>, %20, %cst_15 [0] : vector<2x4xf32> to vector<4xf32>
    %22 = vector.shape_cast %21 : vector<4xf32> to vector<1x4xf32>
    %23 = vector.broadcast %17 : vector<2x1xf32> to vector<2x4xf32>
    %24 = arith.mulf %19, %23 : vector<2x4xf32>
    %cst_16 = arith.constant dense<0.000000e+00> : vector<4xf32>
    %25 = vector.multi_reduction <add>, %24, %cst_16 [0] : vector<2x4xf32> to vector<4xf32>
    %26 = vector.shape_cast %25 : vector<4xf32> to vector<1x4xf32>
    %27 = arith.divf %22, %26 : vector<1x4xf32>
    %c0_17 = arith.constant 0 : index
    %c0_18 = arith.constant 0 : index
    %28 = vector.load %arg5[%c0_17, %c0_18] : memref<8x4xf32, #tpu.memory_space<vmem>>, vector<8x4xf32>
    %29 = vector.broadcast %27 : vector<1x4xf32> to vector<8x4xf32>
    %30 = arith.mulf %28, %29 : vector<8x4xf32>
    %cst_19 = arith.constant dense<0.000000e+00> : vector<8x256xf32>
    %31 = tpu.matmul %30, %5, %cst_19 {dimension_numbers = #tpu.dot_dimension_numbers<[1], [0], [0], [1], [0, 0, 1, 1], [], []>} : vector<8x4xf32>, vector<4x256xf32>, vector<8x256xf32> -> vector<8x256xf32>
    %c0_20 = arith.constant 0 : index
    %c0_21 = arith.constant 0 : index
    %32 = vector.load %arg6[%c0_20, %c0_21] : memref<8x1xf32, #tpu.memory_space<vmem>>, vector<8x1xf32>
    %33 = vector.broadcast %32 : vector<8x1xf32> to vector<8x256xf32>
    %34 = arith.addf %31, %33 : vector<8x256xf32>
    %cst_22 = arith.constant dense<0.000000e+00> : vector<8xf32>
    %35 = vector.multi_reduction <add>, %34, %cst_22 [1] : vector<8x256xf32> to vector<8xf32>
    %36 = vector.shape_cast %35 : vector<8xf32> to vector<8x1xf32>
    %37 = arith.mulf %34, %34 : vector<8x256xf32>
    %cst_23 = arith.constant dense<0.000000e+00> : vector<8xf32>
    %38 = vector.multi_reduction <add>, %37, %cst_23 [1] : vector<8x256xf32> to vector<8xf32>
    %39 = vector.shape_cast %38 : vector<8xf32> to vector<8x1xf32>
    %c0_24 = arith.constant 0 : index
    %c0_25 = arith.constant 0 : index
    %40 = vector.load %arg10[%c0_24, %c0_25] : memref<8x8xf32, #tpu.memory_space<vmem>>, vector<8x8xf32>
    %cst_26 = arith.constant dense<0.000000e+00> : vector<8x1xf32>
    %41 = tpu.matmul %40, %36, %cst_26 {dimension_numbers = #tpu.dot_dimension_numbers<[1], [0], [0], [1], [0, 0, 1, 1], [], []>} : vector<8x8xf32>, vector<8x1xf32>, vector<8x1xf32> -> vector<8x1xf32>
    %cst_27 = arith.constant 0.001953125 : f32
    %42 = vector.broadcast %cst_27 : f32 to vector<8x1xf32>
    %43 = arith.mulf %41, %42 : vector<8x1xf32>
    %c0_28 = arith.constant 0 : index
    %c0_29 = arith.constant 0 : index
    %44 = vector.load %arg10[%c0_28, %c0_29] : memref<8x8xf32, #tpu.memory_space<vmem>>, vector<8x8xf32>
    %cst_30 = arith.constant dense<0.000000e+00> : vector<8x1xf32>
    %45 = tpu.matmul %44, %39, %cst_30 {dimension_numbers = #tpu.dot_dimension_numbers<[1], [0], [0], [1], [0, 0, 1, 1], [], []>} : vector<8x8xf32>, vector<8x1xf32>, vector<8x1xf32> -> vector<8x1xf32>
    %cst_31 = arith.constant 0.001953125 : f32
    %46 = vector.broadcast %cst_31 : f32 to vector<8x1xf32>
    %47 = arith.mulf %45, %46 : vector<8x1xf32>
    %48 = arith.mulf %43, %43 : vector<8x1xf32>
    %49 = arith.subf %47, %48 : vector<8x1xf32>
    %cst_32 = arith.constant 9.99999974E-6 : f32
    %50 = vector.broadcast %cst_32 : f32 to vector<8x1xf32>
    %51 = arith.addf %49, %50 : vector<8x1xf32>
    %52 = math.rsqrt %51 : vector<8x1xf32>
    %c0_33 = arith.constant 0 : index
    %c0_34 = arith.constant 0 : index
    %53 = vector.load %arg7[%c0_33, %c0_34] : memref<8x1xf32, #tpu.memory_space<vmem>>, vector<8x1xf32>
    %54 = vector.broadcast %43 : vector<8x1xf32> to vector<8x256xf32>
    %55 = arith.subf %34, %54 : vector<8x256xf32>
    %56 = vector.broadcast %53 : vector<8x1xf32> to vector<8x256xf32>
    %57 = arith.mulf %56, %55 : vector<8x256xf32>
    %58 = vector.broadcast %52 : vector<8x1xf32> to vector<8x256xf32>
    %59 = arith.mulf %57, %58 : vector<8x256xf32>
    %c0_35 = arith.constant 0 : index
    %c0_36 = arith.constant 0 : index
    %60 = vector.load %arg8[%c0_35, %c0_36] : memref<8x1xf32, #tpu.memory_space<vmem>>, vector<8x1xf32>
    %61 = vector.broadcast %60 : vector<8x1xf32> to vector<8x256xf32>
    %62 = arith.addf %59, %61 : vector<8x256xf32>
    %63 = arith.addf %62, %0 : vector<8x256xf32>
    %c0_37 = arith.constant 0 : index
    %c0_38 = arith.constant 0 : index
    %64 = vector.load %arg11[%c0_37, %c0_38] : memref<8x256xf32, #tpu.memory_space<vmem>>, vector<8x256xf32>
    tpu.vector_store %arg11[%c0_37, %c0_38], %63 {strides = array<i32>} : memref<8x256xf32, #tpu.memory_space<vmem>>, vector<8x256xf32>,
    return
  }
}

</mosaic_0001>

<bundles_post_ra>
// kernel: tpu_custom_call.1
= control target key start
LH: loop header
LB: loop body
LE: loop exit
PB: predicated region body
PF: predicated region fallthrough
CT: control target
= control target key end

     0   :  { %vm48_vm0 = vcmask 64512   ;;  %v668_v3 = vmov 0.0   ;;  %v669_v5 = vmov 0   ;;  %s804_s0 = inlined_call_operand.vmem [shape: f32[8,256], index: 0, kind: input, shape index: {}]   ;;  %s805_s1 = inlined_call_operand.vmem [shape: f32[4,8], index: 1, kind: input, shape index: {}]   ;;  %s806_s2 = inlined_call_operand.vmem [shape: f32[4,1], index: 2, kind: input, shape index: {}]   ;;  %s807_s3 = inlined_call_operand.vmem [shape: f32[2,4], index: 3, kind: input, shape index: {}]   ;;  %s808_s4 = inlined_call_operand.vmem [shape: f32[2,1], index: 4, kind: input, shape index: {}]   ;;  %s809_s5 = inlined_call_operand.vmem [shape: f32[8,4], index: 5, kind: input, shape index: {}]   ;;  %s810_s6 = inlined_call_operand.vmem [shape: f32[8,1], index: 6, kind: input, shape index: {}]   ;;  %s811_s7 = inlined_call_operand.vmem [shape: f32[8,1], index: 7, kind: input, shape index: {}]   ;;  %s812_s8 = inlined_call_operand.vmem [shape: f32[8,1], index: 8, kind: input, shape index: {}]   ;;  %s813_s9 = inlined_call_operand.vmem [shape: f32[2,4], index: 9, kind: input, shape index: {}]   ;;  %s814_s10 = inlined_call_operand.vmem [shape: f32[8,8], index: 10, kind: input, shape index: {}]   ;;  %s815_s11 = inlined_call_operand.hbm [shape: f32[8,256], index: 11, kind: output, shape index: {}]  }
   0x1   :  { %v735_v0 = vld [vmem:[%s804_s0 + $0x8] sm:$0xff]  ;;  %v740_v1 = vld [vmem:[%s804_s0] sm:$0xff]  ;;  %116 = vmatprep.mubr.f32.mxu0 %v668_v3  ;;  %634 = vset.pattern.permute.xlu0 %v669_v5 }
   0x2   :  { %v41_v2 = vld [vmem:[%s805_s1] sm:$0xf]  ;;  %52 = vmatprep.subr.mxu0 %v735_v0 }
   0x3   :  { %v42_v4 = vld [vmem:[%s806_s2] sm:$0xf]  ;;  %53 = vmatpush1.msra.mxu0 %v740_v1 }
   0x4   :  { %16 = vsyncpa [#allocation3], 0  ;;  %607 = vmatmul.mubr.msk.f32.vlgmr.msra.gmra.mrb[0].mxu0 %vm48_vm0, %v41_v2  ;;  %45 = vperm.xlu0 %634, %v42_v4   ;;  %v124_v6 = vld [vmem:[%s808_s4] sm:$0x3]  ;;  %vm134_vm1 = vcmask 1043456   ;;  %vm130_vm2 = vcmask 31744  }
   0x5   :  { %205 = vmatprep.mubr.f32.mxu1 %v668_v3  ;;  %635 = vset.pattern.permute.xlu1 %v669_v5  ;;  %v321_v7 = vld [vmem:[%s810_s6] sm:$0xff]  ;;  %vm212_vm3 = vcmask 1041408   ;;  %vm301_vm4 = vcmask 25600   ;;  %vm670_vm5 = vmmov 0   ;;  %s671_s12 = smov [#allocation2]  }
   0x6   :  { %v123_v13 = vld [vmem:[%s807_s3] sm:$0x3]  ;;  %s599_s13 = sshll.u32 %s671_s12, 4  ;;  %s600_s13 = int_to_ptr.vmem [resolvable:$true] %s599_s13 }
   0x7   :  { %v299_v32 = vld [vmem:[%s813_s9] sm:$0x3]  ;;  %p649_p1 = scmp.lt.s32.totalorder %s600_s13, %s600_s13 }
   0x8   :  { %127 = vperm.xlu0 %634, %v124_v6   ;;  %v319_v53 = vld [vmem:[%s809_s5] sm:$0xff] }
   0x9   :  { %v559_v4 = vld [vmem:[%s811_s7] sm:$0xff] }
   0xa   :  { %v409_v5 = vld [vmem:[%s814_s10] sm:$0xff] }
   0xc   :  { %324 = vperm.xlu0 %634, %v321_v7  }
  0x83   :  { %v46_v9 = vpop.permute.xlu0 %45 }
  0x87   :  { %v128_v14 = vpop.permute.xlu0 %127 }
  0x8b   :  { %v325_v56 = vpop.permute.xlu0 %324 }
  0xd7   :  { %v118_v8 = vpop.f32.mrb[0].mxu0 }
  0xd8   :  { %v120_v10 = vpop.f32.mrb[1].mxu0  ;;  %v119_v12 = vadd.f32 %v118_v8, %v46_v9 }
  0xd9   :  { %v121_v11 = vadd.f32 %v120_v10, %v46_v9 }
  0xdb   :  { %608 = vmatprep.subr.msk.mxu1 %vm134_vm1, %v121_v11  ;;  %229 = vmatprep.subr.mxu0 %v121_v11 }
  0xdc   :  { %609 = vmatpush1.msk.msra.mxu1 %vm134_vm1, %v119_v12  ;;  %230 = vmatpush1.xpose.msra.mxu0 %v119_v12 }
  0xdd   :  { %610 = vmatmul.mubr.msk.f32.vlgmr.msra.gmra.mrb[0].mxu1 %vm130_vm2, %v123_v13  ;;  %611 = vmatprep.subr.msk.mxu1 %vm134_vm1, %v121_v11 }
  0xde   :  { %612 = vmatpush1.msk.msra.mxu1 %vm134_vm1, %v119_v12  ;;  %394 = vmatprep.mubr.f32.mxu1 %v668_v3 }
  0xdf   :  { %620 = vmatprep.subr.mxu0 %v668_v3  ;;  %625 = vmatprep.subr.mxu1 %v668_v3 }
 0x1b0   :  { %v207_v15 = vpop.f32.mrb[0].mxu1 }
 0x1b1   :  { %v208_v16 = vadd.f32 %v207_v15, %v128_v14  ;;  %v209_v17 = vpop.f32.mrb[1].mxu1 }
 0x1b2   :  { %v210_v18 = vadd.f32 %v209_v17, %v128_v14  ;;  %v581_v17 = vld [vmem:[%s812_s8] sm:$0xff]  ;;  %s644_s8 = scalar_lea.vmem %s600_s13, 256 }
 0x1b3   :  { %v213_v19 = vsel %vm212_vm3, %v208_v16, -inf  ;;  %p645_p0 = scmp.ne.s32.totalorder %s600_s13, %s644_s8  ;;  %p650_p2 = scmp.lt.s32.totalorder %s644_s8, %s644_s8 }
 0x1b4   :  { %v214_v20 = vsel %vm212_vm3, %v210_v18, -inf }
 0x1b5   :  { %v215_v21 = vmax.f32 %v213_v19, %v214_v20  ;;  %p651_p3 = por %p650_p2, %p649_p1 }
 0x1b7   :  { %216 = vmax.xlane.f32.xlu1 %v215_v21  ;;  %p652_p4 = pnand %p651_p3, %p645_p0 }
 0x244   :  { %v217_v22 = vpop.xlane.xlu1 %216 }
 0x245   :  { %v218_v23 = vsub.f32 %v208_v16, %v217_v22  ;;  %v219_v24 = vsub.f32 %v210_v18, %v217_v22 }
 0x247   :  { %v220_v25 = vmul.f32 1.442695, %v218_v23  ;;  %v222_v26 = vmul.f32 1.442695, %v219_v24 }
 0x249   :  { %636 = vpow2.f32 %v220_v25 }
 0x24a   :  { %638 = vpow2.f32 %v222_v26 }
 0x253   :  { %v637_v27 = vpop.eup %636 }
 0x254   :  { %v639_v28 = vpop.eup %638  ;;  %v224_v29 = vsel %vm212_vm3, %v637_v27, 0.0 }
 0x255   :  { %293 = vmatprep.mubr.f32.mxu0 %v639_v28  ;;  %v225_v30 = vsel %vm212_vm3, %v639_v28, 0.0 }
 0x256   :  { %294 = vmatmul.mubr.f32.vlgmr.msra.gmra.mrb[2].mxu0 %v637_v27  ;;  %v226_v31 = vadd.f32 %v225_v30, %v224_v29 }
 0x257   :  { %622 = vmatprep.mubr.msk.f32.mxu0 %vm670_vm5, %v668_v3 }
 0x258   :  { %227 = vadd.xlane.f32.xlu1 %v226_v31 }
 0x2e5   :  { %v228_v33 = vpop.xlane.xlu1 %227 }
 0x2e6   :  { %v309_v34 = vmul.f32 %v299_v32, %v228_v33 }
 0x2e8   :  { %v310_v35 = vsel %vm301_vm4, %v309_v34, 0.0 }
 0x2e9   :  { %v311_v36 = vrot.slane %v310_v35, 4 }
 0x2eb   :  { %v312_v37 = vadd.f32 %v311_v36, %v310_v35 }
 0x2ed   :  { %v313_v38 = vrot.slane %v312_v37, 2 }
 0x2ef   :  { %v314_v39 = vadd.f32 %v313_v38, %v312_v37 }
 0x2f1   :  { %v315_v40 = vrot.slane %v314_v39, 1 }
 0x2f3   :  { %v316_v42 = vadd.f32 %v315_v40, %v314_v39 }
 0x2f5   :  { %640 = vrcp.f32 %v316_v42 }
 0x2ff   :  { %v641_v52 = vpop.eup %640 }
 0x329   :  { %v295_v41 = vpop.f32.mrb[2].mxu0 }
 0x32a   :  { %v300_v43 = vmul.f32 %v299_v32, %v295_v41  ;;  %v297_v44 = vpop.f32.mrb[3].mxu0 }
 0x32c   :  { %v302_v45 = vsel %vm301_vm4, %v300_v43, 0.0 }
 0x32d   :  { %v303_v46 = vrot.slane %v302_v45, 4 }
 0x32f   :  { %v304_v47 = vadd.f32 %v303_v46, %v302_v45 }
 0x331   :  { %v305_v48 = vrot.slane %v304_v47, 2 }
 0x333   :  { %v306_v49 = vadd.f32 %v305_v48, %v304_v47 }
 0x335   :  { %v307_v50 = vrot.slane %v306_v49, 1 }
 0x337   :  { %v308_v51 = vadd.f32 %v307_v50, %v306_v49 }
 0x339   :  { %v318_v54 = vmul.f32 %v641_v52, %v308_v51 }
 0x33b   :  { %v320_v55 = vmul.f32 %v319_v53, %v318_v54 }
 0x33d   :  { %613 = vmatmul.mubr.msk.f32.vlgmr.msra.gmra.mrb[2].mxu1 %vm130_vm2, %v320_v55 }
 0x33e   :  { %627 = vmatprep.mubr.msk.f32.mxu1 %vm670_vm5, %v668_v3 }
 0x410   :  { %v396_v57 = vpop.f32.mrb[2].mxu1 }
 0x411   :  { %v397_v58 = vadd.f32 %v396_v57, %v325_v56  ;;  %v398_v59 = vpop.f32.mrb[3].mxu1 }
 0x412   :  { %v399_v60 = vadd.f32 %v398_v59, %v325_v56 }
 0x413   :  { %v404_v61 = vmul.f32 %v397_v58, %v397_v58 }
 0x414   :  { %v401_v62 = vadd.f32 %v399_v60, %v397_v58  ;;  %v405_v63 = vmul.f32 %v399_v60, %v399_v60 }
 0x416   :  { %402 = vadd.xlane.f32.xlu1 %v401_v62  ;;  %v406_v2 = vadd.f32 %v405_v63, %v404_v61 }
 0x418   :  { %407 = vadd.xlane.f32.xlu0 %v406_v2 }
 0x427   :  { %569 = vperm.xlu1 %635, %v559_v4  }
 0x4a3   :  { %v403_v6 = vpop.xlane.xlu1 %402 }
 0x4a4   :  { %621 = vmatpush3.msra.mxu0 %v403_v6 }
 0x4a5   :  { %v408_v7 = vpop.xlane.xlu0 %407  ;;  %623 = vmatmul.mubr.msk.f32.vlgmr.msra.gmra.mrb[4].mxu0 %vm48_vm0, %v409_v5 }
 0x4a6   :  { %626 = vmatpush3.msra.mxu1 %v408_v7 }
 0x4a7   :  { %628 = vmatmul.mubr.msk.f32.vlgmr.msra.gmra.mrb[4].mxu1 %vm48_vm0, %v409_v5  ;;  %v570_v18 = vpop.permute.xlu1 %569 }
 0x578   :  { %v479_v8 = vpop.f32.mrb[4].mxu0 }
 0x579   :  { %v483_v9 = vmul.f32 0.001953125, %v479_v8  ;;  %v624_v3 = vpop.f32.mrb[5].mxu0 }
 0x57a   :  { %v550_v10 = vpop.f32.mrb[4].mxu1 }
 0x57b   :  { %v555_v11 = vmul.f32 %v483_v9, %v483_v9  ;;  %v554_v12 = vmul.f32 0.001953125, %v550_v10  ;;  %562 = vperm.xlu1 %635, %v483_v9   ;;  %v629_v13 = vpop.f32.mrb[5].mxu1 }
 0x57d   :  { %v556_v14 = vsub.f32 %v554_v12, %v555_v11 }
 0x57f   :  { %v557_v15 = vadd.f32 1e-05, %v556_v14 }
 0x581   :  { %642 = vrsqrt.f32 %v557_v15 }
 0x58b   :  { %v643_v16 = vpop.eup %642 }
 0x58c   :  { %576 = vperm.xlu1 %635, %v643_v16  }
 0x590   :  { %584 = vperm.xlu1 %635, %v581_v17  }
 0x5fa   :  { %v563_v19 = vpop.permute.xlu1 %562 }
 0x5fb   :  { %v565_v20 = vsub.f32 %v397_v58, %v563_v19  ;;  %v566_v21 = vsub.f32 %v399_v60, %v563_v19 }
 0x5fd   :  { %v572_v23 = vmul.f32 %v570_v18, %v565_v20  ;;  %v573_v24 = vmul.f32 %v570_v18, %v566_v21 }
 0x60b   :  { %v577_v22 = vpop.permute.xlu1 %576 }
 0x60c   :  { %v579_v25 = vmul.f32 %v577_v22, %v572_v23  ;;  %v580_v26 = vmul.f32 %v577_v22, %v573_v24 }
 0x60f   :  { %v585_v27 = vpop.permute.xlu1 %584 }
 0x610   :  { %v587_v28 = vadd.f32 %v585_v27, %v579_v25  ;;  %v588_v29 = vadd.f32 %v585_v27, %v580_v26 }
 0x612   :  { %v589_v30 = vadd.f32 %v587_v28, %v740_v1  ;;  %v590_v31 = vadd.f32 %v588_v29, %v735_v0 }
 0x614   :  { %591 = vst [vmem:[#allocation2] sm:$0xff] %v589_v30  ;;  %592 = vst [vmem:[#allocation2 + $0x8] sm:$0xff] %v590_v31 }
 0x615   :  { %655 = shalt.err (!%p652_p4)
}
 0x616   :  { %s656_s16 = scalar_lea.hbm %s815_s11, 256 }
 0x617   :  { %p657_p5 = scmp.ne.s32.totalorder %s815_s11, %s656_s16  ;;  %p660_p6 = scmp.lt.u32.totalorder %s656_s16, %s815_s11 }
 0x619   :  { %p662_p7 = pnand %p660_p6, %p657_p5 }
 0x61b   :  { %665 = shalt.err (!%p662_p7)
}
 0x61c   :  { %602 = dma.vmem_to_hbm [thread:$0]  %s600_s13, 256, %s815_s11, [#allocation3]  }
 0x61d   :  { %666 = dma.done.wait [#allocation3], 256  }
 0x61e   :  { %667 = vsyncadd [#allocation3], 4294967040 }
 0x61f   :  { %606 = vsyncpa [#allocation3], 1 }

</bundles_post_ra>
